<compile_context>
chip_gen: v6e
topology: v6e:2x2x1
jax: 0.10.0
libtpu: 0.0.40
codegen_flags: <defaults>
</compile_context>

<pallas_src>
import math
import functools

import jax
import jax.numpy as jnp
from jax.experimental import pallas as pl
from jax.experimental.pallas import tpu as pltpu


# ---------------------------------------------------------------------------
# helpers
# ---------------------------------------------------------------------------
def _pick_tile(dim, target, align):
    """Largest tile <= target that is a multiple of `align` and divides `dim`
    (falls back to the full dim, which always satisfies the TPU block rule)."""
    if dim <= target or dim % align != 0:
        return dim
    t = (target // align) * align
    while t >= align:
        if dim % t == 0:
            return t
        t -= align
    return dim


# ---------------------------------------------------------------------------
# Kernel 1: LayerNormalization (the Decoder's final norm)
#   PyTorch semantics: mean/std over last dim, std is UNBIASED (N-1),
#   out = alpha * (x - mean) / (std + eps) + bias, alpha/bias are scalars.
# ---------------------------------------------------------------------------
def _layer_norm_kernel(x_ref, alpha_ref, bias_ref, o_ref, *, eps, feat):
    x = x_ref[...].astype(jnp.float32)                       # (tr, D)
    mean = jnp.mean(x, axis=-1, keepdims=True)
    xc = x - mean
    var = jnp.sum(xc * xc, axis=-1, keepdims=True) * (1.0 / (feat - 1))
    std = jnp.sqrt(var)
    inv = pl.reciprocal(std + eps, approx=False)              # exact; EUP slot
    o_ref[...] = (alpha_ref[0] * xc * inv + bias_ref[0]).astype(o_ref.dtype)


def pallas_layer_norm(x, alpha, bias, eps=1e-6):
    """x: (..., D) -> LayerNormalization(x) with PyTorch semantics."""
    orig_shape = x.shape
    d = orig_shape[-1]
    x2d = x.reshape(-1, d)
    rows = x2d.shape[0]
    tr = _pick_tile(rows, 1024, 8)        # pure-bandwidth op -> big row tiles
    kern = functools.partial(_layer_norm_kernel, eps=eps, feat=d)
    out = pl.pallas_call(
        kern,
        out_shape=jax.ShapeDtypeStruct((rows, d), x.dtype),
        grid=(rows // tr,),
        in_specs=[
            pl.BlockSpec((tr, d), lambda i: (i, 0)),
            pl.BlockSpec(memory_space=pltpu.MemorySpace.SMEM),   # alpha (1,)
            pl.BlockSpec(memory_space=pltpu.MemorySpace.SMEM),   # bias  (1,)
        ],
        out_specs=pl.BlockSpec((tr, d), lambda i: (i, 0)),
        compiler_params=pltpu.CompilerParams(dimension_semantics=("parallel",)),
    )(x2d, alpha, bias)
    return out.reshape(orig_shape)


# ---------------------------------------------------------------------------
# Kernel 2: tiled dense layer  y = x @ Wt + b
#   Wt is PRE-transposed (K, N) once at init; K-accumulated with f32 scratch,
#   bias added exactly once in the final-K epilogue.
# ---------------------------------------------------------------------------
def _linear_kernel(x_ref, wt_ref, b_ref, o_ref, acc_ref, *, use_bf16):
    k = pl.program_id(2)

    @pl.when(k == 0)
    def _():
        acc_ref[...] = jnp.zeros_like(acc_ref)

    x = x_ref[...]
    w = wt_ref[...]
    if use_bf16:                                  # bf16 MXU peak, f32 accumulate
        x = x.astype(jnp.bfloat16)
        w = w.astype(jnp.bfloat16)
    acc_ref[...] += jnp.dot(x, w, preferred_element_type=jnp.float32)

    @pl.when(k == pl.num_programs(2) - 1)
    def _():
        o_ref[...] = (acc_ref[...] + b_ref[...]).astype(o_ref.dtype)


def pallas_linear(x2d, wt, b, use_bf16=False):
    """x2d: (M, K), wt: (K, N) already transposed at init, b: (N,) -> (M, N)."""
    m, k_dim = x2d.shape
    n = wt.shape[1]
    b2 = b.reshape(1, n)

    tm = _pick_tile(m, 512, 8)
    tn = _pick_tile(n, 512, 128)
    tk = _pick_tile(k_dim, 1024, 128)

    grid = (m // tm, n // tn, k_dim // tk)
    kern = functools.partial(_linear_kernel, use_bf16=use_bf16)
    return pl.pallas_call(
        kern,
        out_shape=jax.ShapeDtypeStruct((m, n), x2d.dtype),
        grid=grid,
        in_specs=[
            pl.BlockSpec((tm, tk), lambda i, j, kk: (i, kk)),
            pl.BlockSpec((tk, tn), lambda i, j, kk: (kk, j)),
            pl.BlockSpec((1, tn), lambda i, j, kk: (0, j)),
        ],
        out_specs=pl.BlockSpec((tm, tn), lambda i, j, kk: (i, j)),
        scratch_shapes=[pltpu.VMEM((tm, tn), jnp.float32)],
        compiler_params=pltpu.CompilerParams(
            dimension_semantics=("parallel", "parallel", "arbitrary"),
            vmem_limit_bytes=48 * 1024 * 1024,    # fits v7x's 64 MiB with headroom
        ),
    )(x2d, wt, b2)


# ---------------------------------------------------------------------------
# Kernel 3: flash-style multi-head attention.
#   qkv_t layout (B, 3H, S, d_k): grid (B, H, q_tiles, kv_tiles), online
#   softmax with m/l/acc scratch, additive mask bias, scale folded into q.
# ---------------------------------------------------------------------------
def _flash_attn_kernel(q_ref, k_ref, v_ref, bias_ref, o_ref,
                       m_sc, l_sc, acc_sc, *, scale, use_bf16):
    ki = pl.program_id(3)

    @pl.when(ki == 0)
    def _():
        m_sc[...] = jnp.full_like(m_sc, -jnp.inf)
        l_sc[...] = jnp.zeros_like(l_sc)
        acc_sc[...] = jnp.zeros_like(acc_sc)

    q = q_ref[...].astype(jnp.float32) * scale     # scale touches S*d_k, not S*S
    k = k_ref[...]
    v = v_ref[...]
    if use_bf16:
        q = q.astype(jnp.bfloat16)
        k = k.astype(jnp.bfloat16)

    # scores via transposed contraction (no explicit k.T -> no XLU transpose)
    s = jax.lax.dot_general(q, k, (((1,), (1,)), ((), ())),
                            preferred_element_type=jnp.float32)
    s = s + bias_ref[...]                          # additive mask bias (one add)

    m_prev = m_sc[...]
    m_new = jnp.maximum(m_prev, jnp.max(s, axis=-1, keepdims=True))
    corr = jnp.exp(m_prev - m_new)
    p = jnp.exp(s - m_new)
    l_sc[...] = corr * l_sc[...] + jnp.sum(p, axis=-1, keepdims=True)
    pv = p.astype(jnp.bfloat16) if use_bf16 else p
    vv = v.astype(jnp.bfloat16) if use_bf16 else v
    acc_sc[...] = corr * acc_sc[...] + jnp.dot(pv, vv,
                                               preferred_element_type=jnp.float32)
    m_sc[...] = m_new

    @pl.when(ki == pl.num_programs(3) - 1)
    def _():
        # exact divide (the approx reciprocal here was the previous failure)
        o_ref[...] = (acc_sc[...] / l_sc[...]).astype(o_ref.dtype)
        # TODO(synk): attention dropout is identity in eval mode; omitted.


def pallas_flash_attention(qkv_t, mask_bias, num_heads, use_bf16=False):
    """qkv_t: (B, 3H, S, d_k) head-major fused QKV.
    mask_bias: (S, S) additive bias (0 where attended, -1e9 where masked).
    Returns (B, H, S, d_k)."""
    b, three_h, s_len, d_k = qkv_t.shape
    assert three_h == 3 * num_heads
    tq = _pick_tile(s_len, 256, 8)
    tkv = _pick_tile(s_len, 512, 128)
    grid = (b, num_heads, s_len // tq, s_len // tkv)

    kern = functools.partial(_flash_attn_kernel,
                             scale=1.0 / math.sqrt(d_k), use_bf16=use_bf16)
    return pl.pallas_call(
        kern,
        out_shape=jax.ShapeDtypeStruct((b, num_heads, s_len, d_k), qkv_t.dtype),
        grid=grid,
        in_specs=[
            pl.BlockSpec((None, None, tq, d_k),
                         lambda bi, hi, qi, ki: (bi, hi, qi, 0)),                 # Q
            pl.BlockSpec((None, None, tkv, d_k),
                         lambda bi, hi, qi, ki: (bi, num_heads + hi, ki, 0)),     # K
            pl.BlockSpec((None, None, tkv, d_k),
                         lambda bi, hi, qi, ki: (bi, 2 * num_heads + hi, ki, 0)), # V
            pl.BlockSpec((tq, tkv), lambda bi, hi, qi, ki: (qi, ki)),             # bias
        ],
        out_specs=pl.BlockSpec((None, None, tq, d_k),
                               lambda bi, hi, qi, ki: (bi, hi, qi, 0)),
        scratch_shapes=[
            pltpu.VMEM((tq, 1), jnp.float32),      # running max
            pltpu.VMEM((tq, 1), jnp.float32),      # running denom
            pltpu.VMEM((tq, d_k), jnp.float32),    # output accumulator
        ],
        compiler_params=pltpu.CompilerParams(
            dimension_semantics=("parallel", "parallel", "parallel", "arbitrary"),
            vmem_limit_bytes=48 * 1024 * 1024,
        ),
    )(qkv_t, qkv_t, qkv_t, mask_bias)


# ---------------------------------------------------------------------------
# MHA wrapper: fused QKV projection -> flash attention -> output projection.
# ---------------------------------------------------------------------------
def prepare_mha_params(raw):
    """ONE-TIME (init-time) fusion + transpose of projection weights so no
    per-forward concatenate/transpose re-materializes weights in HBM."""
    wt_qkv = jnp.concatenate([raw["w_q"], raw["w_k"], raw["w_v"]], axis=0).T
    b_qkv = jnp.concatenate([raw["b_q"], raw["b_k"], raw["b_v"]], axis=0)
    return {"wt_qkv": wt_qkv, "b_qkv": b_qkv,          # (K, 3*d_model), (3*d_model,)
            "wt_o": raw["w_o"].T, "b_o": raw["b_o"]}   # (K, d_model),   (d_model,)


def multi_head_self_attention(params, x, h, mask=None, use_bf16=False):
    """x: (B, S, d_model) -> (B, S, d_model)."""
    b, s_len, d_model = x.shape
    assert d_model % h == 0
    d_k = d_model // h

    qkv = pallas_linear(x.reshape(b * s_len, d_model),
                        params["wt_qkv"], params["b_qkv"], use_bf16=use_bf16)
    # head-major layout so each per-head block is full-lane (d_k is the full
    # last dim): no misaligned intra-vreg slicing inside the kernel.
    qkv_t = qkv.reshape(b, s_len, 3 * h, d_k).transpose(0, 2, 1, 3)

    if mask is None:
        bias = jnp.zeros((s_len, s_len), jnp.float32)
    else:
        bias = (mask.astype(jnp.float32) - 1.0) * 1e9      # 1 -> 0, 0 -> -1e9
    o = pallas_flash_attention(qkv_t, bias, h, use_bf16=use_bf16)   # (B,H,S,d_k)

    o = o.transpose(0, 2, 1, 3).reshape(b * s_len, d_model)
    out = pallas_linear(o, params["wt_o"], params["b_o"], use_bf16=use_bf16)
    return out.reshape(b, s_len, d_model)


# ---------------------------------------------------------------------------
# Decoder forward: run the layer stack, then the final LayerNormalization.
# ---------------------------------------------------------------------------
def decoder_forward(norm_params, x, encoder_output, src_mask, tgt_mask, layers=()):
    # TODO(synk): the DecoderBlock layer class is not part of the provided
    #             spec; `layers` is a sequence of callables with signature
    #             layer(x, encoder_output, src_mask, tgt_mask), mirroring the
    #             nn.ModuleList the PyTorch Decoder is constructed with.
    for layer in layers:
        x = layer(x, encoder_output, src_mask, tgt_mask)
    return pallas_layer_norm(x, norm_params["alpha"], norm_params["bias"], eps=1e-6)


def make_self_attention_layer(params, h, use_bf16=False):
    """Example decoder layer (masked self-attention) built from the Pallas
    MHA building blocks, used to exercise the full decoder path."""
    def layer(x, encoder_output, src_mask, tgt_mask):
        del encoder_output, src_mask
        return multi_head_self_attention(params, x, h, tgt_mask, use_bf16=use_bf16)
    return layer


# ---------------------------------------------------------------------------
def init_mha_params(key, d_model):
    keys = jax.random.split(key, 8)
    scale = 1.0 / math.sqrt(d_model)

    def lin(kw, kb):
        w = jax.random.uniform(kw, (d_model, d_model), jnp.float32, -scale, scale)
        bb = jax.random.uniform(kb, (d_model,), jnp.float32, -scale, scale)
        return w, bb

    w_q, b_q = lin(keys[0], keys[1])
    w_k, b_k = lin(keys[2], keys[3])
    w_v, b_v = lin(keys[4], keys[5])
    w_o, b_o = lin(keys[6], keys[7])
    return dict(w_q=w_q, b_q=b_q, w_k=w_k, b_k=b_k,
                w_v=w_v, b_v=b_v, w_o=w_o, b_o=b_o)


# ---------------------------------------------------------------------------
# pure-JAX references (high-precision matmuls so the f32 check is meaningful)
# ---------------------------------------------------------------------------
def ref_layer_norm(x, alpha, bias, eps=1e-6):
    mean = x.mean(axis=-1, keepdims=True)
    var = jnp.sum((x - mean) ** 2, axis=-1, keepdims=True) / (x.shape[-1] - 1)
    std = jnp.sqrt(var)                          # unbiased, like torch.std
    return alpha * (x - mean) / (std + eps) + bias


def ref_mha(raw, x, h, mask):
    b, s, d = x.shape
    d_k = d // h
    hp = jax.lax.Precision.HIGHEST

    def lin(t, w, bias):
        return jnp.einsum("bsk,nk->bsn", t, w, precision=hp) + bias

    q = lin(x, raw["w_q"], raw["b_q"]).reshape(b, s, h, d_k).transpose(0, 2, 1, 3)
    k = lin(x, raw["w_k"], raw["b_k"]).reshape(b, s, h, d_k).transpose(0, 2, 1, 3)
    v = lin(x, raw["w_v"], raw["b_v"]).reshape(b, s, h, d_k).transpose(0, 2, 1, 3)
    sc = jnp.einsum("bhqd,bhkd->bhqk", q, k, precision=hp) / math.sqrt(d_k)
    sc = jnp.where(mask[None, None, :, :] == 0, -1e9, sc)
    w_ = jax.nn.softmax(sc, axis=-1)
    o = jnp.einsum("bhqk,bhkd->bhqd", w_, v,
                   precision=hp).transpose(0, 2, 1, 3).reshape(b, s, d)
    return lin(o, raw["w_o"], raw["b_o"])


# ---------------------------------------------------------------------------
if __name__ == "__main__":
    B, S, D_MODEL, H = 2, 8, 32, 4

    key = jax.random.PRNGKey(0)
    kx, ke, kp = jax.random.split(key, 3)
    x = jax.random.normal(kx, (B, S, D_MODEL), jnp.float32)
    encoder_output = jax.random.normal(ke, (B, S, D_MODEL), jnp.float32)
    src_mask = jnp.ones((S, S), jnp.float32)
    tgt_mask = jnp.tril(jnp.ones((S, S), jnp.float32))     # causal target mask

    # LayerNormalization parameters (PyTorch init: ones / zeros, scalars)
    norm_params = {"alpha": jnp.ones((1,), jnp.float32),
                   "bias": jnp.zeros((1,), jnp.float32)}
    raw_mha = init_mha_params(kp, D_MODEL)
    mha_params = prepare_mha_params(raw_mha)               # fused + transposed ONCE

    # --- 1) Decoder with an empty layer stack: output == LayerNormalization(x)
    out_empty = decoder_forward(norm_params, x, encoder_output,
                                src_mask, tgt_mask, layers=())
    jax.block_until_ready(out_empty)
    ref_empty = ref_layer_norm(x, 1.0, 0.0)
    assert out_empty.shape == (B, S, D_MODEL)
    assert jnp.allclose(out_empty, ref_empty, atol=1e-5, rtol=1e-5)

    # --- 2) Decoder with one masked self-attention layer (fused-QKV linear,
    # --- flash attention kernel, o-proj linear, LN kernel), f32 path
    layers = (make_self_attention_layer(mha_params, H),)
    out = decoder_forward(norm_params, x, encoder_output,
                          src_mask, tgt_mask, layers=layers)
    jax.block_until_ready(out)
    ref = ref_layer_norm(ref_mha(raw_mha, x, H, tgt_mask), 1.0, 0.0)
    assert out.shape == (B, S, D_MODEL)
    assert jnp.allclose(out, ref, atol=3e-3, rtol=3e-3)

    # --- 3) bf16 MXU-operand path (f32 accumulators): loose tolerance check
    layers_bf16 = (make_self_attention_layer(mha_params, H, use_bf16=True),)
    out_bf16 = decoder_forward(norm_params, x, encoder_output,
                               src_mask, tgt_mask, layers=layers_bf16)
    jax.block_until_ready(out_bf16)
    assert out_bf16.shape == (B, S, D_MODEL)
    assert float(jnp.max(jnp.abs(out_bf16 - ref))) < 0.1

    print("KERNEL_OK")
</pallas_src>

<mosaic_0001>
module attributes {stable_mosaic.version = 11 : i64} {
  func.func @_layer_norm_kernel(%arg0: i32, %arg1: memref<16x32xf32, #tpu.memory_space<vmem>>, %arg2: memref<1xf32, #tpu.memory_space<smem>>, %arg3: memref<1xf32, #tpu.memory_space<smem>>, %arg4: memref<16x32xf32, #tpu.memory_space<vmem>>) attributes {dimension_semantics = [#tpu.dimension_semantics<parallel>], iteration_bounds = array<i64: 1>, scalar_prefetch = 0 : i64, scratch_operands = 0 : i64, tpu.core_type = #tpu.core_type<tc>, window_params = [{transform_indices = @transform_0, window_bounds = array<i64: 16, 32>}, {transform_indices = @transform_1, window_bounds = array<i64: 1>}, {transform_indices = @transform_2, window_bounds = array<i64: 1>}, {transform_indices = @transform_3, window_bounds = array<i64: 16, 32>}]} {
    %c0 = arith.constant 0 : index
    %c0_0 = arith.constant 0 : index
    %0 = vector.load %arg1[%c0, %c0_0] : memref<16x32xf32, #tpu.memory_space<vmem>>, vector<16x32xf32>
    %cst = arith.constant dense<0.000000e+00> : vector<16xf32>
    %1 = vector.multi_reduction <add>, %0, %cst [1] : vector<16x32xf32> to vector<16xf32>
    %2 = vector.shape_cast %1 : vector<16xf32> to vector<16x1xf32>
    %cst_1 = arith.constant 3.200000e+01 : f32
    %3 = vector.broadcast %cst_1 : f32 to vector<16x1xf32>
    %4 = arith.divf %2, %3 : vector<16x1xf32>
    %5 = vector.broadcast %4 : vector<16x1xf32> to vector<16x32xf32>
    %6 = arith.subf %0, %5 : vector<16x32xf32>
    %7 = arith.mulf %6, %6 : vector<16x32xf32>
    %cst_2 = arith.constant dense<0.000000e+00> : vector<16xf32>
    %8 = vector.multi_reduction <add>, %7, %cst_2 [1] : vector<16x32xf32> to vector<16xf32>
    %9 = vector.shape_cast %8 : vector<16xf32> to vector<16x1xf32>
    %cst_3 = arith.constant 0.0322580636 : f32
    %10 = vector.broadcast %cst_3 : f32 to vector<16x1xf32>
    %11 = arith.mulf %9, %10 : vector<16x1xf32>
    %12 = math.sqrt %11 : vector<16x1xf32>
    %cst_4 = arith.constant 9.99999997E-7 : f32
    %13 = vector.broadcast %cst_4 : f32 to vector<16x1xf32>
    %14 = arith.addf %12, %13 : vector<16x1xf32>
    %15 = tpu.reciprocal %14 : vector<16x1xf32> -> vector<16x1xf32>
    %c0_5 = arith.constant 0 : index
    %16 = memref.load %arg2[%c0_5] : memref<1xf32, #tpu.memory_space<smem>>
    %17 = vector.broadcast %16 : f32 to vector<16x32xf32>
    %18 = arith.mulf %17, %6 : vector<16x32xf32>
    %19 = vector.broadcast %15 : vector<16x1xf32> to vector<16x32xf32>
    %20 = arith.mulf %18, %19 : vector<16x32xf32>
    %c0_6 = arith.constant 0 : index
    %21 = memref.load %arg3[%c0_6] : memref<1xf32, #tpu.memory_space<smem>>
    %22 = vector.broadcast %21 : f32 to vector<16x32xf32>
    %23 = arith.addf %20, %22 : vector<16x32xf32>
    %c0_7 = arith.constant 0 : index
    %c0_8 = arith.constant 0 : index
    %24 = vector.load %arg4[%c0_7, %c0_8] : memref<16x32xf32, #tpu.memory_space<vmem>>, vector<16x32xf32>
    tpu.vector_store %arg4[%c0_7, %c0_8], %23 {strides = array<i32>} : memref<16x32xf32, #tpu.memory_space<vmem>>, vector<16x32xf32>,
    return
  }
  func.func @transform_0(%arg0: i32) -> (i32, i32) {
    %c0_i32 = arith.constant 0 : i32
    %c0_i32_0 = arith.constant 0 : i32
    return %arg0, %c0_i32 : i32, i32
  }
  func.func @transform_1(%arg0: i32) -> i32 {
    %c0_i32 = arith.constant 0 : i32
    %c0_i32_0 = arith.constant 0 : i32
    return %c0_i32 : i32
  }
  func.func @transform_2(%arg0: i32) -> i32 {
    %c0_i32 = arith.constant 0 : i32
    %c0_i32_0 = arith.constant 0 : i32
    return %c0_i32 : i32
  }
  func.func @transform_3(%arg0: i32) -> (i32, i32) {
    %c0_i32 = arith.constant 0 : i32
    %c0_i32_0 = arith.constant 0 : i32
    return %arg0, %c0_i32 : i32, i32
  }
}

</mosaic_0001>

<bundles_post_ra>
// kernel: tpu_custom_call.1
= control target key start
LH: loop header
LB: loop body
LE: loop exit
PB: predicated region body
PF: predicated region fallthrough
CT: control target
= control target key end

     0   :  { %10 = vsyncpa [#allocation5], 0  ;;  %s206_s0 = inlined_call_operand.hbm [shape: f32[16,32], index: 0, kind: input, shape index: {}]   ;;  %s207_s1 = inlined_call_operand.<no memory space> [shape: f32[1], index: 1, kind: input, shape index: {}]   ;;  %s208_s2 = inlined_call_operand.<no memory space> [shape: f32[1], index: 2, kind: input, shape index: {}]   ;;  %s209_s3 = inlined_call_operand.hbm [shape: f32[16,32], index: 3, kind: output, shape index: {}]  }
   0x1   :  { %11 = vsyncpa [#allocation6], 0  ;;  %s158_s12 = smov [#allocation4]  }
   0x2   :  { %s17_s13 = sshll.u32 %s158_s12, 4  ;;  %s18_s13 = int_to_ptr.vmem [resolvable:$true] %s17_s13 }
   0x3   :  { %s122_s14 = scalar_lea.vmem %s18_s13, 256  ;;  %p127_p1 = scmp.lt.s32.totalorder %s18_s13, %s18_s13 }
   0x4   :  { %p123_p0 = scmp.ne.s32.totalorder %s18_s13, %s122_s14  ;;  %p128_p2 = scmp.lt.s32.totalorder %s122_s14, %s122_s14 }
   0x6   :  { %p129_p3 = por %p128_p2, %p127_p1 }
   0x8   :  { %p130_p4 = pnand %p129_p3, %p123_p0 }
   0xa   :  { %133 = shalt.err (!%p130_p4)
}
   0xb   :  { %s159_s15 = smov 128   ;;  %s160_s16 = smov 8  }
   0xc   :  { %23 = dma.hbm_to_vmem [thread:$0]  %s206_s0, 256, %s18_s13, [#allocation5], %s159_s15, %s159_s15, %s160_s16  }
   0xd   :  { %154 = dma.done.wait [#allocation5], 256  }
   0xe   :  { %155 = vsyncadd [#allocation5], 4294967040  ;;  %vm33_vm0 = vcmask 261120   ;;  %v31_v0 = vld [vmem:[#allocation4] sm:$0xff]  ;;  %v32_v1 = vld [vmem:[#allocation4 + $0x8] sm:$0xff]  ;;  %v74_v30 = vstv %s207_s1  ;;  %v80_v33 = vstv %s208_s2  ;;  %s161_s22 = smov [#allocation7]  }
   0xf   :  { %v34_v2 = vsel %vm33_vm0, %v31_v0, 0.0  ;;  %v37_v3 = vsel %vm33_vm0, %v32_v1, 0.0  ;;  %s90_s23 = sshll.u32 %s161_s22, 4  ;;  %s91_s23 = int_to_ptr.vmem [resolvable:$true] %s90_s23 }
  0x10   :  { %35 = vadd.xlane.f32.xlu0 %v34_v2  ;;  %s134_s1 = scalar_lea.vmem %s91_s23, 256  ;;  %p139_p6 = scmp.lt.s32.totalorder %s91_s23, %s91_s23 }
  0x11   :  { %p135_p5 = scmp.ne.s32.totalorder %s91_s23, %s134_s1  ;;  %p140_p7 = scmp.lt.s32.totalorder %s134_s1, %s134_s1 }
  0x13   :  { %p141_p8 = por %p140_p7, %p139_p6 }
  0x14   :  { %38 = vadd.xlane.f32.xlu0 %v37_v3 }
  0x15   :  { %p142_p9 = pnand %p141_p8, %p135_p5 }
  0x99   :  { %v36_v4 = vpop.xlane.xlu0 %35 }
  0x9a   :  { %v41_v5 = vmul.f32 0.03125, %v36_v4 }
  0x9c   :  { %v43_v6 = vsub.f32 %v31_v0, %v41_v5 }
  0x9d   :  { %v39_v7 = vpop.xlane.xlu0 %38 }
  0x9e   :  { %v42_v8 = vmul.f32 0.03125, %v39_v7  ;;  %v45_v9 = vmul.f32 %v43_v6, %v43_v6  ;;  %v75_v31 = vmul.f32 %v74_v30, %v43_v6 }
  0xa0   :  { %v44_v10 = vsub.f32 %v32_v1, %v42_v8  ;;  %v47_v11 = vsel %vm33_vm0, %v45_v9, 0.0 }
  0xa1   :  { %48 = vadd.xlane.f32.xlu1 %v47_v11 }
  0xa2   :  { %v46_v12 = vmul.f32 %v44_v10, %v44_v10  ;;  %v76_v35 = vmul.f32 %v74_v30, %v44_v10 }
  0xa4   :  { %v50_v13 = vsel %vm33_vm0, %v46_v12, 0.0 }
  0xa5   :  { %51 = vadd.xlane.f32.xlu1 %v50_v13 }
 0x12a   :  { %v49_v14 = vpop.xlane.xlu1 %48 }
 0x12b   :  { %v53_v15 = vmul.f32 0.032258064, %v49_v14 }
 0x12d   :  { %106 = vrsqrt.f32 %v53_v15  ;;  %vm57_vm1 = vcmp.eq.f32.partialorder %v53_v15, inf  ;;  %v60_v20 = vand.u32 2147483648, %v53_v15  ;;  %vm59_vm2 = vcmp.eq.f32.partialorder %v53_v15, 0.0 }
 0x12e   :  { %v52_v16 = vpop.xlane.xlu1 %51 }
 0x12f   :  { %v54_v17 = vmul.f32 0.032258064, %v52_v16 }
 0x131   :  { %108 = vrsqrt.f32 %v54_v17  ;;  %vm64_vm3 = vcmp.eq.f32.partialorder %v54_v17, inf  ;;  %v67_v26 = vand.u32 2147483648, %v54_v17  ;;  %vm66_vm4 = vcmp.eq.f32.partialorder %v54_v17, 0.0 }
 0x13a   :  { %v107_v18 = vpop.eup %106 }
 0x13b   :  { %v56_v19 = vmul.f32 %v107_v18, %v53_v15 }
 0x13d   :  { %v58_v21 = vsel %vm57_vm1, %v53_v15, %v56_v19 }
 0x13e   :  { %v109_v22 = vpop.eup %108  ;;  %v61_v23 = vsel %vm59_vm2, %v60_v20, %v58_v21 }
 0x13f   :  { %v69_v24 = vadd.f32 1e-06, %v61_v23  ;;  %v63_v25 = vmul.f32 %v109_v22, %v54_v17 }
 0x141   :  { %110 = vrcp.f32 %v69_v24  ;;  %v65_v27 = vsel %vm64_vm3, %v54_v17, %v63_v25 }
 0x142   :  { %v68_v28 = vsel %vm66_vm4, %v67_v26, %v65_v27 }
 0x143   :  { %v70_v29 = vadd.f32 1e-06, %v68_v28 }
 0x145   :  { %112 = vrcp.f32 %v70_v29 }
 0x14e   :  { %v111_v32 = vpop.eup %110 }
 0x14f   :  { %v77_v34 = vmul.f32 %v111_v32, %v75_v31 }
 0x151   :  { %v81_v36 = vadd.f32 %v80_v33, %v77_v34 }
 0x152   :  { %v113_v37 = vpop.eup %112 }
 0x153   :  { %v78_v38 = vmul.f32 %v113_v37, %v76_v35  ;;  %83 = vst.msk [vmem:[#allocation7] sm:$0xff] %vm33_vm0, %v81_v36 }
 0x155   :  { %v82_v39 = vadd.f32 %v80_v33, %v78_v38 }
 0x157   :  { %84 = vst.msk [vmem:[#allocation7 + $0x8] sm:$0xff] %vm33_vm0, %v82_v39 }
 0x158   :  { %145 = shalt.err (!%p142_p9)
}
 0x159   :  { %96 = dma.vmem_to_hbm [thread:$0]  %s91_s23, 256, %s209_s3, [#allocation6], %s159_s15, %s159_s15, %s160_s16  }
 0x15a   :  { %156 = dma.done.wait [#allocation6], 256  }
 0x15b   :  { %157 = vsyncadd [#allocation6], 4294967040 }
 0x15c   :  { %100 = vsyncpa [#allocation5], 1 }
 0x15d   :  { %101 = vsyncpa [#allocation6], 1 }

</bundles_post_ra>
